<compile_context>
chip_gen: v5e
topology: v5e:2x2
jax: 0.10.0
libtpu: 0.0.40
codegen_flags: <defaults>
</compile_context>

<pallas_src>
import jax
import jax.numpy as jnp
from jax.experimental import pallas as pl
from jax.experimental.pallas import tpu as pltpu


def _round_up(n, m):
    return ((n + m - 1) // m) * m


def _vmem_capacity_bytes():
    try:
        return int(pltpu.get_tpu_info().vmem_capacity_bytes)
    except Exception:
        return 64 * 1024 * 1024  # conservative fallback (v7x per-TC VMEM)


# ---------------------------------------------------------------------------
# Kernel 1: power iteration -> scale = lip_const * gamma / sigma  (runs once)
# ---------------------------------------------------------------------------
def make_scale_kernel(pow_iter: int, lip_const: float, use_gamma: bool, eps: float = 1e-12):
    def kernel(w_ref, u_ref, gamma_ref, scale_ref):
        w = w_ref[...]                       # (OP, IP) f32
        u = u_ref[...]                       # (OP, 1)  f32

        def l2n(t):
            return t * jax.lax.rsqrt(jnp.sum(t * t) + eps)

        # W^T @ u and W @ v as VPU broadcast-multiply + cross-lane/sublane
        # reduction: keeps the tiny serial matvec chain off the MXU/MRF.
        def wT_u(u_col):                     # -> (1, IP) row vector
            return jnp.sum(w * u_col, axis=0, keepdims=True)

        def w_v(v_row):                      # -> (OP, 1) column vector
            return jnp.sum(w * v_row, axis=1, keepdims=True)

        # Matches torch power_iteration(): pow_iter <= 1 runs exactly one v/u step.
        for _ in range(pow_iter - 1):
            v = l2n(wT_u(u))
            u = l2n(w_v(v))
        v = l2n(wT_u(u))
        wv = w_v(v)
        u_new = l2n(wv)
        sigma = jnp.sum(u_new * wv)

        scale = lip_const / sigma
        if use_gamma:
            scale = gamma_ref[0, 0] * scale
        scale_ref[0, 0] = scale
        # TODO(synk): training-mode in-place update of the `u` buffer is not
        # written back; add u_new as an output (+ input_output_aliases) if needed.

    return kernel


# ---------------------------------------------------------------------------
# Kernel 2: gridded y = (x * scale) @ W^T + b   (bf16 MXU, f32 accumulate)
# ---------------------------------------------------------------------------
def matmul_kernel(scale_ref, x_ref, w_ref, b_ref, o_ref):
    scale = scale_ref[0, 0]                                   # SMEM scalar
    xb = (x_ref[...] * scale).astype(jnp.bfloat16)            # fold scale into x tile
    y = jax.lax.dot_general(                                  # no w.T materialized
        xb, w_ref[...],
        dimension_numbers=(((1,), (1,)), ((), ())),
        preferred_element_type=jnp.float32)                   # (TB, OP) f32
    o_ref[...] = (y + b_ref[...]).astype(o_ref.dtype)         # bias-only epilogue


def snlinear_forward(x, weight, u, gamma, bias, *, pow_iter=1, lip_const=1.0,
                     use_gamma=True):
    """x: (B, in_ft); weight: (out_ft, in_ft); u: (out_ft,); gamma: (1,) or None;
    bias: (out_ft,) or None. Returns (B, out_ft) float32."""
    B, in_ft = x.shape
    out_ft = weight.shape[0]

    # Lane/sublane-friendly padded shapes (zero padding is exact here).
    IP = _round_up(in_ft, 128)
    OP = _round_up(out_ft, 128)

    vmem = _vmem_capacity_bytes()
    # Batch tile: large enough to amortize per-step overhead, small enough that
    # resident bf16 W + double-buffered f32 x/out tiles fit with headroom.
    tb = min(512, _round_up(B, 8))
    budget = vmem // 2
    w_bytes = OP * IP * 2                     # resident bf16 weight
    per_row = 2 * 4 * (IP + OP)               # double-buffered f32 x row + out row
    if budget > w_bytes + 8 * per_row:
        max_rows = (budget - w_bytes) // per_row
        tb = min(tb, max(8, (max_rows // 8) * 8))
    BP = _round_up(B, tb)

    f32 = jnp.float32
    xp = jnp.zeros((BP, IP), f32).at[:B, :in_ft].set(x.astype(f32))
    wp = jnp.zeros((OP, IP), f32).at[:out_ft, :in_ft].set(weight.astype(f32))
    up = jnp.zeros((OP, 1), f32).at[:out_ft, 0].set(u.astype(f32))
    gp = (gamma if (use_gamma and gamma is not None)
          else jnp.ones((1,), f32)).reshape(1, 1).astype(f32)
    bp = jnp.zeros((1, OP), f32)
    if bias is not None:
        bp = bp.at[0, :out_ft].set(bias.astype(f32))

    # --- 1) sigma / scale (tiny; power iteration stays in f32, off the MXU) ---
    scale = pl.pallas_call(
        make_scale_kernel(pow_iter, float(lip_const), use_gamma),
        out_shape=jax.ShapeDtypeStruct((1, 1), f32),
        in_specs=[
            pl.BlockSpec(memory_space=pltpu.MemorySpace.VMEM),   # W (f32, padded)
            pl.BlockSpec(memory_space=pltpu.MemorySpace.VMEM),   # u (OP, 1)
            pl.BlockSpec(memory_space=pltpu.MemorySpace.SMEM),   # gamma (1, 1)
        ],
        out_specs=pl.BlockSpec(memory_space=pltpu.MemorySpace.SMEM),
    )(wp, up, gp)

    # --- 2) batch-tiled bf16 matmul with the weight resident in VMEM ---------
    out = pl.pallas_call(
        matmul_kernel,
        out_shape=jax.ShapeDtypeStruct((BP, OP), f32),
        grid=(BP // tb,),
        in_specs=[
            pl.BlockSpec(memory_space=pltpu.MemorySpace.SMEM),   # scale (1, 1)
            pl.BlockSpec((tb, IP), lambda i: (i, 0)),            # x tile
            pl.BlockSpec((OP, IP), lambda i: (0, 0)),            # W resident (bf16)
            pl.BlockSpec((1, OP), lambda i: (0, 0)),             # bias row
        ],
        out_specs=pl.BlockSpec((tb, OP), lambda i: (i, 0)),
        compiler_params=pltpu.CompilerParams(
            dimension_semantics=("parallel",),                   # 2 TCs on v7x
            vmem_limit_bytes=int(vmem * 3 // 4),
        ),
    )(scale, xp, wp.astype(jnp.bfloat16), bp)

    return out[:B, :out_ft]


def reference_forward(x, weight, u, gamma, bias, *, pow_iter=1, lip_const=1.0,
                      use_gamma=True, eps=1e-12):
    def l2n(t):
        return t / jnp.sqrt(jnp.sum(t * t) + eps)

    uu = u
    for _ in range(pow_iter - 1):
        v = l2n(weight.T @ uu)
        uu = l2n(weight @ v)
    v = l2n(weight.T @ uu)
    wv = weight @ v
    u_new = l2n(wv)
    sigma = jnp.dot(u_new, wv)
    wb = lip_const * weight / sigma
    if use_gamma:
        wb = gamma[0] * wb
    y = x @ wb.T
    if bias is not None:
        y = y + bias
    return y


if __name__ == "__main__":
    key = jax.random.PRNGKey(0)
    k_w, k_u, k_x, k_b = jax.random.split(key, 4)

    batch, in_ft, out_ft = 8, 32, 16
    pow_iter, lip_const, use_gamma = 1, 1.0, True

    # kaiming_normal_(mode='fan_in') -> std = sqrt(2 / in_ft)
    weight = jax.random.normal(k_w, (out_ft, in_ft), jnp.float32) * jnp.sqrt(2.0 / in_ft)
    u = jax.random.normal(k_u, (out_ft,), jnp.float32)
    bias = 0.1 * jax.random.normal(k_b, (out_ft,), jnp.float32)
    gamma = jnp.full((1,), 1.3, jnp.float32)

    x = jax.random.normal(k_x, (batch, in_ft), jnp.float32)

    out = snlinear_forward(x, weight, u, gamma, bias,
                           pow_iter=pow_iter, lip_const=lip_const, use_gamma=use_gamma)
    out = jax.block_until_ready(out)

    ref = reference_forward(x, weight, u, gamma, bias,
                            pow_iter=pow_iter, lip_const=lip_const, use_gamma=use_gamma)
    assert out.shape == (batch, out_ft)
    # bf16 MXU matmul with f32 accumulation -> compare with bf16-level tolerance.
    assert jnp.allclose(out, ref, atol=5e-2, rtol=5e-2), \
        f"mismatch vs reference, max abs err {float(jnp.max(jnp.abs(out - ref)))}"

    print("KERNEL_OK")
</pallas_src>

<mosaic_0001>
module attributes {stable_mosaic.version = 11 : i64} {
  func.func @kernel(%arg0: memref<128x128xf32, #tpu.memory_space<vmem>>, %arg1: memref<128x1xf32, #tpu.memory_space<vmem>>, %arg2: memref<1x1xf32, #tpu.memory_space<smem>>, %arg3: memref<1x1xf32, #tpu.memory_space<smem>>) attributes {dimension_semantics = [], scalar_prefetch = 0 : i64, scratch_operands = 0 : i64, tpu.core_type = #tpu.core_type<tc>} {
    %c0 = arith.constant 0 : index
    %c0_0 = arith.constant 0 : index
    %0 = vector.load %arg0[%c0, %c0_0] : memref<128x128xf32, #tpu.memory_space<vmem>>, vector<128x128xf32>
    %c0_1 = arith.constant 0 : index
    %c0_2 = arith.constant 0 : index
    %1 = vector.load %arg1[%c0_1, %c0_2] : memref<128x1xf32, #tpu.memory_space<vmem>>, vector<128x1xf32>
    %2 = vector.broadcast %1 : vector<128x1xf32> to vector<128x128xf32>
    %3 = arith.mulf %0, %2 : vector<128x128xf32>
    %cst = arith.constant dense<0.000000e+00> : vector<128xf32>
    %4 = vector.multi_reduction <add>, %3, %cst [0] : vector<128x128xf32> to vector<128xf32>
    %5 = vector.shape_cast %4 : vector<128xf32> to vector<1x128xf32>
    %6 = arith.mulf %5, %5 : vector<1x128xf32>
    %7 = vector.shape_cast %6 : vector<1x128xf32> to vector<1x1x128xf32>
    %cst_3 = arith.constant dense<0.000000e+00> : vector<1xf32>
    %8 = vector.multi_reduction <add>, %7, %cst_3 [1, 2] : vector<1x1x128xf32> to vector<1xf32>
    %9 = vector.shape_cast %8 : vector<1xf32> to vector<1x1x1xf32>
    %10 = vector.extract %9[0, 0, 0] : f32 from vector<1x1x1xf32>
    %cst_4 = arith.constant 9.99999996E-13 : f32
    %11 = arith.addf %10, %cst_4 : f32
    %12 = math.rsqrt %11 : f32
    %13 = vector.broadcast %12 : f32 to vector<1x128xf32>
    %14 = arith.mulf %5, %13 : vector<1x128xf32>
    %15 = vector.broadcast %14 : vector<1x128xf32> to vector<128x128xf32>
    %16 = arith.mulf %0, %15 : vector<128x128xf32>
    %cst_5 = arith.constant dense<0.000000e+00> : vector<128xf32>
    %17 = vector.multi_reduction <add>, %16, %cst_5 [1] : vector<128x128xf32> to vector<128xf32>
    %18 = vector.shape_cast %17 : vector<128xf32> to vector<128x1xf32>
    %19 = arith.mulf %18, %18 : vector<128x1xf32>
    %20 = vector.shape_cast %19 : vector<128x1xf32> to vector<1x128x1xf32>
    %cst_6 = arith.constant dense<0.000000e+00> : vector<1xf32>
    %21 = vector.multi_reduction <add>, %20, %cst_6 [1, 2] : vector<1x128x1xf32> to vector<1xf32>
    %22 = vector.shape_cast %21 : vector<1xf32> to vector<1x1x1xf32>
    %23 = vector.extract %22[0, 0, 0] : f32 from vector<1x1x1xf32>
    %cst_7 = arith.constant 9.99999996E-13 : f32
    %24 = arith.addf %23, %cst_7 : f32
    %25 = math.rsqrt %24 : f32
    %26 = vector.broadcast %25 : f32 to vector<128x1xf32>
    %27 = arith.mulf %18, %26 : vector<128x1xf32>
    %28 = arith.mulf %27, %18 : vector<128x1xf32>
    %29 = vector.shape_cast %28 : vector<128x1xf32> to vector<1x128x1xf32>
    %cst_8 = arith.constant dense<0.000000e+00> : vector<1xf32>
    %30 = vector.multi_reduction <add>, %29, %cst_8 [1, 2] : vector<1x128x1xf32> to vector<1xf32>
    %31 = vector.shape_cast %30 : vector<1xf32> to vector<1x1x1xf32>
    %32 = vector.extract %31[0, 0, 0] : f32 from vector<1x1x1xf32>
    %cst_9 = arith.constant 1.000000e+00 : f32
    %33 = arith.divf %cst_9, %32 : f32
    %c0_10 = arith.constant 0 : index
    %c0_11 = arith.constant 0 : index
    %34 = memref.load %arg2[%c0_10, %c0_11] : memref<1x1xf32, #tpu.memory_space<smem>>
    %35 = arith.mulf %34, %33 : f32
    %c0_12 = arith.constant 0 : index
    %c0_13 = arith.constant 0 : index
    %36 = memref.load %arg3[%c0_12, %c0_13] : memref<1x1xf32, #tpu.memory_space<smem>>
    memref.store %35, %arg3[%c0_12, %c0_13] : memref<1x1xf32, #tpu.memory_space<smem>>
    return
  }
}

</mosaic_0001>

<bundles_post_ra>
// kernel: tpu_custom_call.1
= control target key start
LH: loop header
LB: loop body
LE: loop exit
PB: predicated region body
PF: predicated region fallthrough
CT: control target
= control target key end

     0   :  { %v455_v3 = vmov 0   ;;  %s771_s0 = inlined_call_operand.vmem [shape: f32[128,128], index: 0, kind: input, shape index: {}]   ;;  %s772_s1 = inlined_call_operand.vmem [shape: f32[128,1], index: 1, kind: input, shape index: {}]   ;;  %s773_s2 = inlined_call_operand.<no memory space> [shape: f32[1,1], index: 2, kind: input, shape index: {}]   ;;  %s774_s3 = inlined_call_operand.hbm [shape: f32[1,1], index: 3, kind: output, shape index: {}]  }
   0x1   :  { %v36_v0 = vld [vmem:[%s772_s1 + $0x20] sm:$0xff]  ;;  %v34_v1 = vld [vmem:[%s772_s1 + $0x10] sm:$0xff]  ;;  %434 = vset.pattern.permute.xlu2 %v455_v3  ;;  %433 = vset.pattern.permute.xlu1 %v455_v3 }
   0x2   :  { %v32_v2 = vld [vmem:[%s772_s1] sm:$0xff]  ;;  %432 = vset.pattern.permute.xlu0 %v455_v3  ;;  %70 = vperm.xlu2 %434, %v36_v0  }
   0x3   :  { %60 = vperm.xlu1 %433, %v34_v1   ;;  %50 = vperm.xlu0 %432, %v32_v2  }
   0x4   :  { %9 = vsyncpa [#allocation4], 0  ;;  %v37_v4 = vld [vmem:[%s772_s1 + $0x28] sm:$0xff]  ;;  %v35_v5 = vld [vmem:[%s772_s1 + $0x18] sm:$0xff]  ;;  %vm166_vm0 = vcmask 1040384   ;;  %vm256_vm4 = vcmask 7168  }
   0x5   :  { %v33_v6 = vld [vmem:[%s772_s1 + $0x8] sm:$0xff]  ;;  %v40_v7 = vld [vmem:[%s772_s1 + $0x40] sm:$0xff]  ;;  %v39_v8 = vld [vmem:[%s772_s1 + $0x38] sm:$0xff]  ;;  %s408_s28 = sshll.u32 %s774_s3, 4  ;;  %s456_s6 = smov [#allocation3]   ;;  %s409_s28 = int_to_ptr.hbm [resolvable:$true] %s408_s28 }
   0x6   :  { %v38_v9 = vld [vmem:[%s772_s1 + $0x30] sm:$0xff]  ;;  %v43_v10 = vld [vmem:[%s772_s1 + $0x58] sm:$0xff]  ;;  %v41_v12 = vld [vmem:[%s772_s1 + $0x48] sm:$0xff] }
   0x7   :  { %v42_v11 = vld [vmem:[%s772_s1 + $0x50] sm:$0xff]  ;;  %v45_v14 = vld [vmem:[%s772_s1 + $0x68] sm:$0xff]  ;;  %v44_v15 = vld [vmem:[%s772_s1 + $0x60] sm:$0xff] }
   0x8   :  { %v46_v13 = vld [vmem:[%s772_s1 + $0x70] sm:$0xff]  ;;  %v47_v16 = vld [vmem:[%s772_s1 + $0x78] sm:$0xff]  ;;  %v528_v21 = vld [vmem:[%s771_s0] sm:$0xff] }
   0x9   :  { %v533_v22 = vld [vmem:[%s771_s0 + $0x8] sm:$0xff]  ;;  %v538_v23 = vld [vmem:[%s771_s0 + $0x10] sm:$0xff]  ;;  %v545_v28 = vld [vmem:[%s771_s0 + $0x18] sm:$0xff] }
   0xa   :  { %75 = vperm.xlu2 %434, %v37_v4   ;;  %v551_v31 = vld [vmem:[%s771_s0 + $0x20] sm:$0xff]  ;;  %v557_v34 = vld [vmem:[%s771_s0 + $0x28] sm:$0xff]  ;;  %v563_v40 = vld [vmem:[%s771_s0 + $0x30] sm:$0xff] }
   0xb   :  { %65 = vperm.xlu1 %433, %v35_v5   ;;  %55 = vperm.xlu0 %432, %v33_v6   ;;  %v569_v43 = vld [vmem:[%s771_s0 + $0x38] sm:$0xff]  ;;  %v575_v46 = vld [vmem:[%s771_s0 + $0x40] sm:$0xff]  ;;  %v581_v49 = vld [vmem:[%s771_s0 + $0x48] sm:$0xff] }
   0xc   :  { %v587_v53 = vld [vmem:[%s771_s0 + $0x50] sm:$0xff]  ;;  %v594_v60 = vld [vmem:[%s771_s0 + $0x58] sm:$0xff]  ;;  %v599_v62 = vld [vmem:[%s771_s0 + $0x60] sm:$0xff] }
   0xd   :  { %v605_v1 = vld [vmem:[%s771_s0 + $0x68] sm:$0xff] }
  0x12   :  { %90 = vperm.xlu2 %434, %v40_v7  }
  0x13   :  { %85 = vperm.xlu1 %433, %v39_v8   ;;  %80 = vperm.xlu0 %432, %v38_v9   ;;  %v612_v8 = vld [vmem:[%s771_s0 + $0x70] sm:$0xff] }
  0x1a   :  { %105 = vperm.xlu2 %434, %v43_v10   ;;  %v617_v10 = vld [vmem:[%s771_s0 + $0x78] sm:$0xff] }
  0x1b   :  { %100 = vperm.xlu1 %433, %v42_v11   ;;  %95 = vperm.xlu0 %432, %v41_v12  }
  0x22   :  { %120 = vperm.xlu2 %434, %v46_v13  }
  0x23   :  { %115 = vperm.xlu1 %433, %v45_v14   ;;  %110 = vperm.xlu0 %432, %v44_v15  }
  0x2b   :  { %125 = vperm.xlu0 %432, %v47_v16  }
  0x5c   :  { %v71_v17 = vpop.permute.xlu2 %70 }
  0x5d   :  { %v132_v35 = vmul.f32 %v71_v17, %v551_v31 }
  0x64   :  { %v76_v20 = vpop.permute.xlu2 %75 }
  0x65   :  { %v133_v41 = vmul.f32 %v76_v20, %v557_v34 }
  0x6c   :  { %v91_v36 = vpop.permute.xlu2 %90 }
  0x6d   :  { %v136_v50 = vmul.f32 %v91_v36, %v575_v46 }
  0x74   :  { %v106_v57 = vpop.permute.xlu2 %105 }
  0x75   :  { %v61_v18 = vpop.permute.xlu1 %60  ;;  %v51_v19 = vpop.permute.xlu0 %50  ;;  %v139_v63 = vmul.f32 %v106_v57, %v594_v60 }
  0x76   :  { %v128_v26 = vmul.f32 %v51_v19, %v528_v21  ;;  %v130_v29 = vmul.f32 %v61_v18, %v538_v23 }
  0x7c   :  { %v121_v7 = vpop.permute.xlu2 %120 }
  0x7d   :  { %v66_v24 = vpop.permute.xlu1 %65  ;;  %v56_v25 = vpop.permute.xlu0 %55  ;;  %v142_v11 = vmul.f32 %v121_v7, %v612_v8 }
  0x7e   :  { %v129_v27 = vmul.f32 %v56_v25, %v533_v22  ;;  %v131_v32 = vmul.f32 %v66_v24, %v545_v28 }
  0x80   :  { %v144_v30 = vadd.f32 %v129_v27, %v128_v26 }
  0x82   :  { %v145_v33 = vadd.f32 %v144_v30, %v130_v29 }
  0x84   :  { %v146_v37 = vadd.f32 %v145_v33, %v131_v32 }
  0x85   :  { %v86_v38 = vpop.permute.xlu1 %85  ;;  %v81_v39 = vpop.permute.xlu0 %80 }
  0x86   :  { %v147_v42 = vadd.f32 %v146_v37, %v132_v35  ;;  %v134_v44 = vmul.f32 %v81_v39, %v563_v40  ;;  %v135_v47 = vmul.f32 %v86_v38, %v569_v43 }
  0x88   :  { %v148_v45 = vadd.f32 %v147_v42, %v133_v41 }
  0x8a   :  { %v149_v48 = vadd.f32 %v148_v45, %v134_v44 }
  0x8c   :  { %v150_v51 = vadd.f32 %v149_v48, %v135_v47 }
  0x8d   :  { %v101_v52 = vpop.permute.xlu1 %100  ;;  %v96_v54 = vpop.permute.xlu0 %95 }
  0x8e   :  { %v137_v55 = vmul.f32 %v96_v54, %v581_v49  ;;  %v151_v56 = vadd.f32 %v150_v51, %v136_v50  ;;  %v138_v58 = vmul.f32 %v101_v52, %v587_v53 }
  0x90   :  { %v152_v59 = vadd.f32 %v151_v56, %v137_v55 }
  0x92   :  { %v153_v61 = vadd.f32 %v152_v59, %v138_v58 }
  0x94   :  { %v154_v4 = vadd.f32 %v153_v61, %v139_v63 }
  0x95   :  { %v116_v0 = vpop.permute.xlu1 %115  ;;  %v111_v2 = vpop.permute.xlu0 %110 }
  0x96   :  { %v140_v3 = vmul.f32 %v111_v2, %v599_v62  ;;  %v141_v5 = vmul.f32 %v116_v0, %v605_v1 }
  0x98   :  { %v155_v6 = vadd.f32 %v154_v4, %v140_v3 }
  0x9a   :  { %v156_v9 = vadd.f32 %v155_v6, %v141_v5 }
  0x9c   :  { %v157_v14 = vadd.f32 %v156_v9, %v142_v11 }
  0x9d   :  { %v126_v12 = vpop.permute.xlu0 %125 }
  0x9e   :  { %v143_v13 = vmul.f32 %v126_v12, %v617_v10 }
  0xa0   :  { %v158_v15 = vadd.f32 %v157_v14, %v143_v13 }
  0xa2   :  { %v159_v16 = vrot.slane %v158_v15, 4 }
  0xa4   :  { %v160_v17 = vadd.f32 %v159_v16, %v158_v15 }
  0xa6   :  { %v161_v18 = vrot.slane %v160_v17, 2 }
  0xa8   :  { %v162_v19 = vadd.f32 %v161_v18, %v160_v17 }
  0xaa   :  { %v163_v20 = vrot.slane %v162_v19, 1 }
  0xac   :  { %v164_v24 = vadd.f32 %v163_v20, %v162_v19 }
  0xae   :  { %v165_v25 = vmul.f32 %v164_v24, %v164_v24 }
  0xb0   :  { %v167_v26 = vsel %vm166_vm0, %v165_v25, 0.0 }
  0xb1   :  { %168 = vadd.xlane.f32.xlu1 %v167_v26 }
 0x124   :  { %v169_v27 = vpop.xlane.xlu1 %168 }
 0x125   :  { %v170_v29 = vrot.slane %v169_v27, 4 }
 0x127   :  { %v171_v30 = vadd.f32 %v170_v29, %v169_v27 }
 0x129   :  { %v172_v32 = vrot.slane %v171_v30, 2 }
 0x12b   :  { %v173_v33 = vadd.f32 %v172_v32, %v171_v30 }
 0x12d   :  { %v174_v35 = vrot.slane %v173_v33, 1 }
 0x12f   :  { %v175_v36 = vadd.f32 %v174_v35, %v173_v33 }
 0x131   :  { %418 = vpush %v175_v36 }
 0x162   :  { %s419_s0 = spop %418 }
 0x163   :  { %s177_s21 = sadd.f32 1e-12, %s419_s0 }
 0x165   :  { %v178_v37 = vstv %s177_s21 }
 0x166   :  { %435 = vrsqrt.f32 %v178_v37  ;;  %vm185_vm2 = vweird.f32 %v178_v37 }
 0x16c   :  { %v436_v38 = vpop.eup %435 }
 0x16d   :  { %v180_v39 = vmul.f32 %v436_v38, %v178_v37  ;;  %vm186_vm1 = vweird.f32 %v436_v38 }
 0x16e   :  { %vm187_vm3 = vmor %vm185_vm2, %vm186_vm1 }
 0x16f   :  { %v181_v41 = vmul.f32 %v436_v38, %v180_v39 }
 0x171   :  { %v182_v42 = vmul.f32 0.5, %v181_v41 }
 0x173   :  { %v183_v44 = vsub.f32 1.5, %v182_v42 }
 0x175   :  { %v184_v45 = vmul.f32 %v436_v38, %v183_v44 }
 0x177   :  { %v188_v47 = vsel %vm187_vm3, %v436_v38, %v184_v45 }
 0x178   :  { %420 = vpush %v188_v47 }
 0x1a9   :  { %s421_s22 = spop %420 }
 0x1aa   :  { %v190_v48 = vstv %s421_s22 }
 0x1ab   :  { %v191_v50 = vmul.f32 %v190_v48, %v164_v24 }
 0x1ad   :  { %v195_v51 = vmul.f32 %v191_v50, %v545_v28  ;;  %v193_v52 = vmul.f32 %v191_v50, %v533_v22  ;;  %v192_v54 = vmul.f32 %v191_v50, %v528_v21  ;;  %v198_v55 = vmul.f32 %v191_v50, %v563_v40 }
 0x1ae   :  { %v197_v56 = vmul.f32 %v191_v50, %v557_v34  ;;  %v194_v57 = vmul.f32 %v191_v50, %v538_v23  ;;  %v201_v58 = vmul.f32 %v191_v50, %v581_v49  ;;  %v200_v28 = vmul.f32 %v191_v50, %v575_v46 }
 0x1af   :  { %214 = vadd.xlane.f32.xlu1 %v195_v51  ;;  %210 = vadd.xlane.f32.xlu0 %v193_v52  ;;  %v196_v22 = vmul.f32 %v191_v50, %v551_v31  ;;  %v204_v21 = vmul.f32 %v191_v50, %v599_v62  ;;  %v203_v40 = vmul.f32 %v191_v50, %v594_v60 }
 0x1b0   :  { %208 = vadd.xlane.f32.xlu2 %v192_v54  ;;  %v199_v34 = vmul.f32 %v191_v50, %v569_v43  ;;  %v207_v23 = vmul.f32 %v191_v50, %v617_v10  ;;  %v206_v49 = vmul.f32 %v191_v50, %v612_v8  ;;  %v202_v46 = vmul.f32 %v191_v50, %v587_v53 }
 0x1b1   :  { %v205_v31 = vmul.f32 %v191_v50, %v605_v1 }
 0x1b7   :  { %220 = vadd.xlane.f32.xlu1 %v198_v55  ;;  %218 = vadd.xlane.f32.xlu0 %v197_v56 }
 0x1b8   :  { %212 = vadd.xlane.f32.xlu2 %v194_v57 }
 0x1bf   :  { %226 = vadd.xlane.f32.xlu1 %v201_v58  ;;  %224 = vadd.xlane.f32.xlu0 %v200_v28 }
 0x1c0   :  { %216 = vadd.xlane.f32.xlu2 %v196_v22 }
 0x1c7   :  { %232 = vadd.xlane.f32.xlu1 %v204_v21  ;;  %230 = vadd.xlane.f32.xlu0 %v203_v40 }
 0x1c8   :  { %222 = vadd.xlane.f32.xlu2 %v199_v34 }
 0x1cf   :  { %238 = vadd.xlane.f32.xlu1 %v207_v23  ;;  %236 = vadd.xlane.f32.xlu0 %v206_v49 }
 0x1d0   :  { %228 = vadd.xlane.f32.xlu2 %v202_v46 }
 0x1d8   :  { %234 = vadd.xlane.f32.xlu2 %v205_v31 }
 0x222   :  { %v637_v59 = vpop.xlane.xlu0 %210  ;;  %v639_v60 = vpop.xlane.xlu1 %214 }
 0x223   :  { %v641_v43 = vpop.xlane.xlu2 %208  ;;  %v241_v61 = vmul.f32 %v637_v59, %v637_v59  ;;  %v243_v6 = vmul.f32 %v639_v60, %v639_v60 }
 0x224   :  { %v240_v62 = vmul.f32 %v641_v43, %v641_v43 }
 0x225   :  { %v258_v0 = vsel %vm256_vm4, %v241_v61, 0.0  ;;  %v262_v9 = vsel %vm256_vm4, %v243_v6, 0.0 }
 0x226   :  { %v257_v1 = vsel %vm256_vm4, %v240_v62, 0.0 }
 0x227   :  { %v259_v5 = vadd.f32 %v258_v0, %v257_v1 }
 0x22a   :  { %v647_v53 = vpop.xlane.xlu0 %218  ;;  %v655_v3 = vpop.xlane.xlu1 %220 }
 0x22b   :  { %v649_v63 = vpop.xlane.xlu2 %212  ;;  %v245_v10 = vmul.f32 %v647_v53, %v647_v53  ;;  %v246_v17 = vmul.f32 %v655_v3, %v655_v3 }
 0x22c   :  { %v242_v2 = vmul.f32 %v649_v63, %v649_v63 }
 0x22d   :  { %v266_v18 = vsel %vm256_vm4, %v245_v10, 0.0  ;;  %v268_v24 = vsel %vm256_vm4, %v246_v17, 0.0 }
 0x22e   :  { %v260_v4 = vsel %vm256_vm4, %v242_v2, 0.0 }
 0x22f   :  { %v261_v7 = vadd.f32 %v260_v4, %v259_v5 }
 0x231   :  { %v263_v13 = vadd.f32 %v262_v9, %v261_v7 }
 0x232   :  { %v667_v12 = vpop.xlane.xlu0 %224  ;;  %v670_v15 = vpop.xlane.xlu1 %226 }
 0x233   :  { %v660_v8 = vpop.xlane.xlu2 %216  ;;  %v248_v25 = vmul.f32 %v667_v12, %v667_v12  ;;  %v249_v33 = vmul.f32 %v670_v15, %v670_v15 }
 0x234   :  { %v244_v11 = vmul.f32 %v660_v8, %v660_v8 }
 0x235   :  { %v272_v35 = vsel %vm256_vm4, %v248_v25, 0.0  ;;  %v274_v39 = vsel %vm256_vm4, %v249_v33, 0.0 }
 0x236   :  { %v264_v14 = vsel %vm256_vm4, %v244_v11, 0.0 }
 0x237   :  { %v265_v16 = vadd.f32 %v264_v14, %v263_v13 }
 0x239   :  { %v267_v19 = vadd.f32 %v266_v18, %v265_v16 }
 0x23a   :  { %v683_v30 = vpop.xlane.xlu0 %230  ;;  %v688_v36 = vpop.xlane.xlu1 %232 }
 0x23b   :  { %v675_v20 = vpop.xlane.xlu2 %222  ;;  %v269_v27 = vadd.f32 %v268_v24, %v267_v19  ;;  %v251_v41 = vmul.f32 %v683_v30, %v683_v30  ;;  %v252_v48 = vmul.f32 %v688_v36, %v688_v36 }
 0x23c   :  { %v247_v26 = vmul.f32 %v675_v20, %v675_v20 }
 0x23d   :  { %v278_v50 = vsel %vm256_vm4, %v251_v41, 0.0  ;;  %v280_v56 = vsel %vm256_vm4, %v252_v48, 0.0 }
 0x23e   :  { %v270_v29 = vsel %vm256_vm4, %v247_v26, 0.0 }
 0x23f   :  { %v271_v32 = vadd.f32 %v270_v29, %v269_v27 }
 0x241   :  { %v273_v37 = vadd.f32 %v272_v35, %v271_v32 }
 0x242   :  { %v701_v51 = vpop.xlane.xlu0 %236  ;;  %v703_v54 = vpop.xlane.xlu1 %238 }
 0x243   :  { %v690_v38 = vpop.xlane.xlu2 %228  ;;  %v275_v44 = vadd.f32 %v274_v39, %v273_v37  ;;  %v254_v57 = vmul.f32 %v701_v51, %v701_v51  ;;  %v255_v22 = vmul.f32 %v703_v54, %v703_v54 }
 0x244   :  { %v250_v42 = vmul.f32 %v690_v38, %v690_v38 }
 0x245   :  { %v284_v34 = vsel %vm256_vm4, %v254_v57, 0.0  ;;  %v286_v49 = vsel %vm256_vm4, %v255_v22, 0.0 }
 0x246   :  { %v276_v45 = vsel %vm256_vm4, %v250_v42, 0.0 }
 0x247   :  { %v277_v47 = vadd.f32 %v276_v45, %v275_v44 }
 0x249   :  { %v279_v52 = vadd.f32 %v278_v50, %v277_v47 }
 0x24b   :  { %v705_v55 = vpop.xlane.xlu2 %234  ;;  %v281_v28 = vadd.f32 %v280_v56, %v279_v52 }
 0x24c   :  { %v253_v58 = vmul.f32 %v705_v55, %v705_v55 }
 0x24e   :  { %v282_v21 = vsel %vm256_vm4, %v253_v58, 0.0 }
 0x24f   :  { %v283_v40 = vadd.f32 %v282_v21, %v281_v28 }
 0x251   :  { %v285_v23 = vadd.f32 %v284_v34, %v283_v40 }
 0x253   :  { %v287_v46 = vadd.f32 %v286_v49, %v285_v23 }
 0x255   :  { %288 = vadd.xlane.f32.xlu2 %v287_v46 }
 0x2c8   :  { %v289_v31 = vpop.xlane.xlu2 %288 }
 0x2c9   :  { %v290_v61 = vrot.slane %v289_v31, 4 }
 0x2cb   :  { %v291_v62 = vadd.f32 %v290_v61, %v289_v31 }
 0x2cd   :  { %v292_v0 = vrot.slane %v291_v62, 2 }
 0x2cf   :  { %v293_v1 = vadd.f32 %v292_v0, %v291_v62 }
 0x2d1   :  { %v294_v2 = vrot.slane %v293_v1, 1 }
 0x2d3   :  { %v295_v4 = vadd.f32 %v294_v2, %v293_v1 }
 0x2d5   :  { %422 = vpush %v295_v4 }
 0x306   :  { %s423_s1 = spop %422 }
 0x307   :  { %s297_s23 = sadd.f32 1e-12, %s423_s1 }
 0x309   :  { %v298_v5 = vstv %s297_s23 }
 0x30a   :  { %437 = vrsqrt.f32 %v298_v5  ;;  %vm305_vm6 = vweird.f32 %v298_v5 }
 0x310   :  { %v438_v6 = vpop.eup %437 }
 0x311   :  { %v300_v7 = vmul.f32 %v438_v6, %v298_v5  ;;  %vm306_vm5 = vweird.f32 %v438_v6 }
 0x312   :  { %vm307_vm7 = vmor %vm305_vm6, %vm306_vm5 }
 0x313   :  { %v301_v9 = vmul.f32 %v438_v6, %v300_v7 }
 0x315   :  { %v302_v10 = vmul.f32 0.5, %v301_v9 }
 0x317   :  { %v303_v11 = vsub.f32 1.5, %v302_v10 }
 0x319   :  { %v304_v13 = vmul.f32 %v438_v6, %v303_v11 }
 0x31b   :  { %v308_v14 = vsel %vm307_vm7, %v438_v6, %v304_v13 }
 0x31c   :  { %424 = vpush %v308_v14 }
 0x34d   :  { %s425_s24 = spop %424 }
 0x34e   :  { %v310_v16 = vstv %s425_s24 }
 0x34f   :  { %v311_v17 = vmul.f32 %v310_v16, %v641_v43  ;;  %v312_v18 = vmul.f32 %v310_v16, %v637_v59  ;;  %v313_v19 = vmul.f32 %v310_v16, %v649_v63  ;;  %v314_v24 = vmul.f32 %v310_v16, %v639_v60 }
 0x350   :  { %v315_v27 = vmul.f32 %v310_v16, %v660_v8  ;;  %v316_v32 = vmul.f32 %v310_v16, %v647_v53  ;;  %v317_v41 = vmul.f32 %v310_v16, %v655_v3  ;;  %v318_v44 = vmul.f32 %v310_v16, %v675_v20 }
 0x351   :  { %v327_v25 = vmul.f32 %v311_v17, %v641_v43  ;;  %v328_v26 = vmul.f32 %v312_v18, %v637_v59  ;;  %v329_v29 = vmul.f32 %v313_v19, %v649_v63  ;;  %v330_v33 = vmul.f32 %v314_v24, %v639_v60 }
 0x352   :  { %v331_v42 = vmul.f32 %v315_v27, %v660_v8  ;;  %v332_v63 = vmul.f32 %v316_v32, %v647_v53  ;;  %v319_v60 = vmul.f32 %v310_v16, %v667_v12  ;;  %v333_v48 = vmul.f32 %v317_v41, %v655_v3 }
 0x353   :  { %v343_v35 = vsel %vm256_vm4, %v327_v25, 0.0  ;;  %v344_v37 = vsel %vm256_vm4, %v328_v26, 0.0  ;;  %v346_v43 = vsel %vm256_vm4, %v329_v29, 0.0  ;;  %v348_v45 = vsel %vm256_vm4, %v330_v33, 0.0 }
 0x354   :  { %v345_v39 = vadd.f32 %v344_v37, %v343_v35  ;;  %v350_v50 = vsel %vm256_vm4, %v331_v42, 0.0  ;;  %v320_v56 = vmul.f32 %v310_v16, %v670_v15  ;;  %v334_v8 = vmul.f32 %v318_v44, %v675_v20 }
 0x355   :  { %v352_v57 = vsel %vm256_vm4, %v332_v63, 0.0  ;;  %v321_v28 = vmul.f32 %v310_v16, %v690_v38  ;;  %v335_v53 = vmul.f32 %v319_v60, %v667_v12  ;;  %v354_v22 = vsel %vm256_vm4, %v333_v48, 0.0 }
 0x356   :  { %v347_v59 = vadd.f32 %v346_v43, %v345_v39  ;;  %v322_v40 = vmul.f32 %v310_v16, %v683_v30  ;;  %v336_v3 = vmul.f32 %v320_v56, %v670_v15  ;;  %v356_v34 = vsel %vm256_vm4, %v334_v8, 0.0 }
 0x357   :  { %v323_v49 = vmul.f32 %v310_v16, %v688_v36  ;;  %v337_v20 = vmul.f32 %v321_v28, %v690_v38  ;;  %v358_v46 = vsel %vm256_vm4, %v335_v53, 0.0  ;;  %v324_v61 = vmul.f32 %v310_v16, %v705_v55 }
 0x358   :  { %v349_v47 = vadd.f32 %v348_v45, %v347_v59  ;;  %v338_v12 = vmul.f32 %v322_v40, %v683_v30  ;;  %v360_v62 = vsel %vm256_vm4, %v336_v3, 0.0  ;;  %v325_v1 = vmul.f32 %v310_v16, %v701_v51 }
 0x359   :  { %v339_v15 = vmul.f32 %v323_v49, %v688_v36  ;;  %v362_v2 = vsel %vm256_vm4, %v337_v20, 0.0  ;;  %v326_v5 = vmul.f32 %v310_v16, %v703_v54  ;;  %v340_v38 = vmul.f32 %v324_v61, %v705_v55 }
 0x35a   :  { %v351_v52 = vadd.f32 %v350_v50, %v349_v47  ;;  %v364_v6 = vsel %vm256_vm4, %v338_v12, 0.0  ;;  %v341_v9 = vmul.f32 %v325_v1, %v701_v51 }
 0x35b   :  { %v366_v30 = vsel %vm256_vm4, %v339_v15, 0.0  ;;  %v342_v11 = vmul.f32 %v326_v5, %v703_v54  ;;  %v368_v13 = vsel %vm256_vm4, %v340_v38, 0.0 }
 0x35c   :  { %v353_v58 = vadd.f32 %v352_v57, %v351_v52  ;;  %v370_v14 = vsel %vm256_vm4, %v341_v9, 0.0 }
 0x35d   :  { %v372_v16 = vsel %vm256_vm4, %v342_v11, 0.0 }
 0x35e   :  { %v355_v21 = vadd.f32 %v354_v22, %v353_v58 }
 0x360   :  { %v357_v23 = vadd.f32 %v356_v34, %v355_v21 }
 0x362   :  { %v359_v31 = vadd.f32 %v358_v46, %v357_v23 }
 0x364   :  { %v361_v0 = vadd.f32 %v360_v62, %v359_v31 }
 0x366   :  { %v363_v4 = vadd.f32 %v362_v2, %v361_v0 }
 0x368   :  { %v365_v7 = vadd.f32 %v364_v6, %v363_v4 }
 0x36a   :  { %v367_v10 = vadd.f32 %v366_v30, %v365_v7 }
 0x36c   :  { %v369_v36 = vadd.f32 %v368_v13, %v367_v10 }
 0x36e   :  { %v371_v17 = vadd.f32 %v370_v14, %v369_v36 }
 0x370   :  { %v373_v18 = vadd.f32 %v372_v16, %v371_v17 }
 0x372   :  { %374 = vadd.xlane.f32.xlu0 %v373_v18 }
 0x3e5   :  { %v375_v55 = vpop.xlane.xlu0 %374 }
 0x3e6   :  { %v376_v19 = vrot.slane %v375_v55, 4 }
 0x3e8   :  { %v377_v24 = vadd.f32 %v376_v19, %v375_v55 }
 0x3ea   :  { %v378_v25 = vrot.slane %v377_v24, 2 }
 0x3ec   :  { %v379_v51 = vadd.f32 %v378_v25, %v377_v24 }
 0x3ee   :  { %v380_v26 = vrot.slane %v379_v51, 1 }
 0x3f0   :  { %v381_v27 = vadd.f32 %v380_v26, %v379_v51 }
 0x3f2   :  { %426 = vpush %v381_v27 }
 0x423   :  { %s427_s25 = spop %426 }
 0x424   :  { %v383_v54 = vstv %s427_s25 }
 0x425   :  { %439 = vrcp.f32 %v383_v54  ;;  %v395_v35 = vand.u32 2147483648, %v383_v54  ;;  %v393_v39 = vand.u32 2147483647, %v383_v54  ;;  %vm389_vm9 = vweird.f32 %v383_v54 }
 0x427   :  { %v396_v42 = vor.u32 1.1754944e-38, %v395_v35  ;;  %vm394_vm11 = vcmp.eq.f32.partialorder %v393_v39, 8.507059e+37 }
 0x42b   :  { %v440_v29 = vpop.eup %439 }
 0x42c   :  { %v385_v32 = vmul.f32 %v440_v29, %v383_v54  ;;  %vm390_vm8 = vweird.f32 %v440_v29 }
 0x42d   :  { %vm391_vm10 = vmor %vm389_vm9, %vm390_vm8 }
 0x42e   :  { %v386_v33 = vsub.f32 1.0, %v385_v32 }
 0x430   :  { %v387_v37 = vmul.f32 %v440_v29, %v386_v33 }
 0x432   :  { %v388_v41 = vadd.f32 %v440_v29, %v387_v37 }
 0x434   :  { %v392_v43 = vsel %vm391_vm10, %v440_v29, %v388_v41 }
 0x435   :  { %v397_v59 = vsel %vm394_vm11, %v396_v42, %v392_v43 }
 0x436   :  { %428 = vpush %v397_v59 }
 0x467   :  { %s429_s29 = spop %428 }
 0x468   :  { %s400_s5 = smul.f32 %s429_s29, %s773_s2 }
 0x46a   :  { %402 = sst [smem:[#allocation3]] %s400_s5 }
 0x46b   :  { %411 = dma.smem_to_hbm %s456_s6, 16, %s409_s28, [#allocation4]  }
 0x46c   :  { %453 = dma.done.wait [#allocation4], 16  }
 0x46d   :  { %454 = vsyncadd [#allocation4], 4294967280 }
 0x46e   :  { %416 = sfence }
 0x46f   :  { %417 = vsyncpa [#allocation4], 1 }

</bundles_post_ra>
